<compile_context>
chip_gen: v7x
topology: tpu7x:2x2x1
jax: 0.10.0
libtpu: 0.0.40
codegen_flags: <defaults>
</compile_context>

<pallas_src>
import jax
import jax.numpy as jnp
from jax.experimental import pallas as pl
from jax.experimental.pallas import tpu as pltpu


def _round_up(x: int, m: int) -> int:
    return ((x + m - 1) // m) * m


def _vmem_budgets():
    """Per-generation (input-tile budget, vmem limit) in bytes."""
    try:
        cap = pltpu.get_tpu_info().vmem_capacity_bytes
    except Exception:
        cap = 64 * 1024 * 1024                      # assume v7x-class if unknown
    if cap >= 128 * 1024 * 1024:                    # v5e / v6e: 128 MiB VMEM
        return 12 * 1024 * 1024, 96 * 1024 * 1024
    return 4 * 1024 * 1024, 40 * 1024 * 1024        # v7x: 64 MiB VMEM per TC


# ---------------------------------------------------------------------------
# Pallas kernel: fused attention (scores -> softmax over S -> context) + fc
# ---------------------------------------------------------------------------
def attention_fc_kernel(x_ref, w_attn_ref, b_attn_ref, w_fc_ref, b_fc_ref, o_ref):
    # x_ref:      (TB, S, D)    batch tile of BiLSTM outputs, bf16 in HBM/VMEM
    # w_attn_ref: (1, D)        attention weight as a lane-dense f32 row
    # b_attn_ref: (1, 1)        attention bias (SMEM scalar)
    # w_fc_ref:   (D, O_pad)    final linear weight, transposed + zero-padded
    # b_fc_ref:   (1, O_pad)    final linear bias, zero-padded
    # o_ref:      (TB, O_pad)   lane-dense logits slab, f32
    x = x_ref[...].astype(jnp.float32)             # upcast once; HBM stays bf16
    w = w_attn_ref[...]                            # (1, D) f32
    b = b_attn_ref[0, 0]                           # scalar from SMEM

    # Lane-dense scores (TB, S): broadcast-multiply + reduce over the lane (D)
    # axis. Kernel is HBM-read-bound, so this VPU/XLU work hides under the DMA.
    scores = jnp.sum(x * w[None, :, :], axis=-1) + b          # (TB, S)

    # Softmax over the sequence axis (dim=1 of the torch module), full width.
    m = jnp.max(scores, axis=1, keepdims=True)                # (TB, 1)
    e = jnp.exp(scores - m)                                   # (TB, S)
    denom = jnp.sum(e, axis=1, keepdims=True)                 # (TB, 1)
    attn = e * pl.reciprocal(denom, approx=False)             # (TB, S)

    # Context: VPU broadcast-mul + sublane reduction over S. Avoids TB
    # independent (1,S)@(S,D) MXU matmuls (M=1 rows, per-matmul MRF drains).
    ctx = jnp.sum(attn[:, :, None] * x, axis=1)               # (TB, D) f32

    # Fused classifier head on the MXU, written as a full lane-dense slab.
    logits = jnp.dot(ctx, w_fc_ref[...], preferred_element_type=jnp.float32)
    o_ref[...] = (logits + b_fc_ref[...]).astype(o_ref.dtype)


def attention_fc_forward(lstm_output, attn_weight, attn_bias, fc_weight, fc_bias,
                         *, block_b=None, feature_dtype=jnp.bfloat16,
                         input_block_budget_bytes=None, vmem_limit_bytes=None):
    """
    lstm_output: (B, S, D) float32, D = hidden_dim * 2
    attn_weight: (1, D)    PyTorch nn.Linear(D, 1) weight layout
    attn_bias:   (1,)
    fc_weight:   (O, D)    PyTorch nn.Linear(D, O) weight layout
    fc_bias:     (O,)
    returns:     (B, O)    float32 logits
    """
    B, S, D = lstm_output.shape
    O = fc_weight.shape[0]
    O_pad = _round_up(O, 128)                      # lane-dense output slab

    auto_budget, auto_limit = _vmem_budgets()
    if input_block_budget_bytes is None:
        input_block_budget_bytes = auto_budget
    if vmem_limit_bytes is None:
        vmem_limit_bytes = auto_limit

    # Only the large activation tensor goes to reduced precision; weights are
    # tiny, resident, and kept f32 so all in-kernel math is f32.
    feats = lstm_output.astype(feature_dtype)
    itemsize = jnp.dtype(feature_dtype).itemsize

    # Batch tile: as many rows as fit the per-buffer VMEM budget (double-
    # buffered by the pipeline, plus the in-kernel f32 copy + product temp),
    # multiple of 8 sublanes.
    b_pad8 = _round_up(B, 8)
    if block_b is None:
        rows = input_block_budget_bytes // max(S * D * itemsize, 1)
        block_b = max(8, (rows // 8) * 8)
        tb = min(block_b, b_pad8)
        # v7x has 2 TensorCores; make the "parallel" batch axis produce >= 2
        # grid steps whenever the 8-padded batch allows it.
        if b_pad8 >= 16 and b_pad8 // tb < 2:
            tb = _round_up(pl.cdiv(b_pad8, 2), 8)
    else:
        tb = min(block_b, b_pad8)
    b_pad = _round_up(B, tb)
    if b_pad != B:
        # Zero-padded rows give a uniform softmax over zero features -> zero
        # context -> logits = fc bias; they are sliced off below.
        feats = jnp.pad(feats, ((0, b_pad - B), (0, 0), (0, 0)))

    w_attn_row = attn_weight.reshape(1, D).astype(jnp.float32)     # lane-dense
    b_attn_2d = attn_bias.reshape(1, 1).astype(jnp.float32)        # SMEM scalar
    w_fc_slab = jnp.zeros((D, O_pad), jnp.float32).at[:, :O].set(
        jnp.transpose(fc_weight).astype(jnp.float32))
    b_fc_slab = jnp.zeros((1, O_pad), jnp.float32).at[:, :O].set(
        fc_bias.reshape(1, O).astype(jnp.float32))

    out = pl.pallas_call(
        attention_fc_kernel,
        out_shape=jax.ShapeDtypeStruct((b_pad, O_pad), jnp.float32),
        grid_spec=pltpu.PrefetchScalarGridSpec(
            num_scalar_prefetch=0,
            grid=(b_pad // tb,),
            in_specs=[
                pl.BlockSpec((tb, S, D), lambda b: (b, 0, 0)),      # batch tile (bf16)
                pl.BlockSpec((1, D), lambda b: (0, 0)),             # attn weight (resident)
                pl.BlockSpec(memory_space=pltpu.MemorySpace.SMEM),  # attn bias scalar
                pl.BlockSpec((D, O_pad), lambda b: (0, 0)),         # fc weight slab (resident)
                pl.BlockSpec((1, O_pad), lambda b: (0, 0)),         # fc bias slab (resident)
            ],
            out_specs=pl.BlockSpec((tb, O_pad), lambda b: (b, 0)),  # lane-dense slab
        ),
        compiler_params=pltpu.CompilerParams(
            dimension_semantics=("parallel",),      # megacore-shardable batch axis
            vmem_limit_bytes=vmem_limit_bytes,
        ),
    )(feats, w_attn_row, b_attn_2d, w_fc_slab, b_fc_slab)
    return out[:B, :O]


# ---------------------------------------------------------------------------
# Pure-JAX embedding + bidirectional LSTM (sequential recurrence, no Pallas)
# ---------------------------------------------------------------------------
def _lstm_direction(emb, w_ih, w_hh, b_ih, b_hh, reverse=False):
    B, S, E = emb.shape
    H = w_hh.shape[1]
    # Hoist the input projection out of the recurrence: one MXU-friendly matmul
    # over all timesteps instead of S tiny latency-bound matmuls inside scan.
    x_proj = emb.reshape(B * S, E) @ w_ih.T + (b_ih + b_hh)   # (B*S, 4H)
    xs = jnp.swapaxes(x_proj.reshape(B, S, 4 * H), 0, 1)      # (S, B, 4H)
    if reverse:
        xs = xs[::-1]

    def step(carry, xp_t):
        h, c = carry
        gates = xp_t + h @ w_hh.T                             # (B, 4H)
        i, f, g, o = jnp.split(gates, 4, axis=-1)             # PyTorch gate order
        i = jax.nn.sigmoid(i)
        f = jax.nn.sigmoid(f)
        g = jnp.tanh(g)
        o = jax.nn.sigmoid(o)
        c_new = f * c + i * g
        h_new = o * jnp.tanh(c_new)
        return (h_new, c_new), h_new

    init = (jnp.zeros((B, H), emb.dtype), jnp.zeros((B, H), emb.dtype))
    _, hs = jax.lax.scan(step, init, xs)                      # (S, B, H)
    if reverse:
        hs = hs[::-1]
    return jnp.swapaxes(hs, 0, 1)                             # (B, S, H)


def bilstm_features(x_ids, params):
    emb = params["embedding"][x_ids]                              # (B, S, E)
    h_f = _lstm_direction(emb, *params["lstm_fwd"])
    h_b = _lstm_direction(emb, *params["lstm_bwd"], reverse=True)
    return jnp.concatenate([h_f, h_b], axis=-1)                   # (B, S, 2H)


def model_forward(x_ids, params):
    """Full BiLSTMAttentionModel forward; attention + fc run in Pallas."""
    lstm_out = bilstm_features(x_ids, params)
    return attention_fc_forward(lstm_out, params["attn_w"], params["attn_b"],
                                params["fc_w"], params["fc_b"])


def model_reference(x_ids, params, feature_dtype=jnp.float32):
    """Pure-JAX reference matching the PyTorch semantics.

    feature_dtype lets the reference use the same bf16-quantized LSTM features
    the Pallas path reads, so the comparison isolates kernel correctness.
    """
    lstm_out = bilstm_features(x_ids, params)
    feats = lstm_out.astype(feature_dtype).astype(jnp.float32)
    scores = jnp.einsum("bsd,od->bso", feats, params["attn_w"],
                        precision=jax.lax.Precision.HIGHEST) + params["attn_b"]
    attn = jax.nn.softmax(scores, axis=1)
    ctx = jnp.sum(attn * feats, axis=1)
    return jnp.dot(ctx, params["fc_w"].T,
                   precision=jax.lax.Precision.HIGHEST) + params["fc_b"]


# ---------------------------------------------------------------------------
# Deterministic parameter init (mirrors PyTorch default inits closely enough)
# ---------------------------------------------------------------------------
def init_params(key, vocab_size, embed_dim, hidden_dim, output_dim, pad_idx):
    D = hidden_dim * 2
    keys = jax.random.split(key, 7)

    emb = jax.random.normal(keys[0], (vocab_size, embed_dim), jnp.float32)
    emb = emb.at[pad_idx].set(0.0)

    def linear_init(k, out_f, in_f):
        kw, kb = jax.random.split(k)
        bound = 1.0 / (in_f ** 0.5)
        w = jax.random.uniform(kw, (out_f, in_f), jnp.float32, -bound, bound)
        b = jax.random.uniform(kb, (out_f,), jnp.float32, -bound, bound)
        return w, b

    def lstm_init(k, input_dim, hidden):
        k1, k2, k3, k4 = jax.random.split(k, 4)
        bound = 1.0 / (hidden ** 0.5)
        w_ih = jax.random.uniform(k1, (4 * hidden, input_dim), jnp.float32, -bound, bound)
        w_hh = jax.random.uniform(k2, (4 * hidden, hidden), jnp.float32, -bound, bound)
        b_ih = jax.random.uniform(k3, (4 * hidden,), jnp.float32, -bound, bound)
        b_hh = jax.random.uniform(k4, (4 * hidden,), jnp.float32, -bound, bound)
        return w_ih, w_hh, b_ih, b_hh

    attn_w, attn_b = linear_init(keys[1], 1, D)
    fc_w, fc_b = linear_init(keys[2], output_dim, D)
    return {
        "embedding": emb,
        "lstm_fwd": lstm_init(keys[3], embed_dim, hidden_dim),
        "lstm_bwd": lstm_init(keys[4], embed_dim, hidden_dim),
        "attn_w": attn_w,
        "attn_b": attn_b,
        "fc_w": fc_w,
        "fc_b": fc_b,
    }


if __name__ == "__main__":
    key = jax.random.PRNGKey(0)
    k_params, k_ids = jax.random.split(key)

    vocab_size = 50
    embed_dim = 16
    hidden_dim = 16          # D = hidden_dim * 2 = 32
    output_dim = 4
    batch, seq = 2, 8
    pad_idx = 0              # vocab['<pad>']

    params = init_params(k_params, vocab_size, embed_dim, hidden_dim,
                         output_dim, pad_idx)
    x_ids = jax.random.randint(k_ids, (batch, seq), 1, vocab_size)
    x_ids = x_ids.at[0, -2:].set(pad_idx)   # a couple of <pad> tokens

    out = jax.jit(model_forward)(x_ids, params)
    out = jax.block_until_ready(out)

    # Reference is fed the same bf16-quantized LSTM features the kernel reads,
    # so any mismatch is a kernel bug rather than the deliberate bf16 cast.
    ref = jax.jit(
        lambda ids, p: model_reference(ids, p, feature_dtype=jnp.bfloat16)
    )(x_ids, params)
    ref = jax.block_until_ready(ref)

    assert out.shape == (batch, output_dim)
    assert jnp.allclose(out, ref, atol=1e-4, rtol=1e-3), "mismatch vs reference"

    print("KERNEL_OK")
</pallas_src>

<mosaic_0001>
module attributes {stable_mosaic.version = 11 : i64} {
  func.func @attention_fc_kernel(%arg0: i32, %arg1: memref<8x8x32xbf16, #tpu.memory_space<vmem>>, %arg2: memref<1x32xf32, #tpu.memory_space<vmem>>, %arg3: memref<1x1xf32, #tpu.memory_space<smem>>, %arg4: memref<32x128xf32, #tpu.memory_space<vmem>>, %arg5: memref<1x128xf32, #tpu.memory_space<vmem>>, %arg6: memref<8x128xf32, #tpu.memory_space<vmem>>) attributes {dimension_semantics = [#tpu.dimension_semantics<parallel>], iteration_bounds = array<i64: 1>, scalar_prefetch = 0 : i64, scratch_operands = 0 : i64, tpu.core_type = #tpu.core_type<tc>, window_params = [{transform_indices = @transform_0, window_bounds = array<i64: 8, 8, 32>}, {pipeline_mode = #tpu.pipeline_mode<synchronous>, transform_indices = @transform_1, window_bounds = array<i64: 1, 32>}, {transform_indices = @transform_2, window_bounds = array<i64: 1, 1>}, {pipeline_mode = #tpu.pipeline_mode<synchronous>, transform_indices = @transform_3, window_bounds = array<i64: 32, 128>}, {pipeline_mode = #tpu.pipeline_mode<synchronous>, transform_indices = @transform_4, window_bounds = array<i64: 1, 128>}, {transform_indices = @transform_5, window_bounds = array<i64: 8, 128>}]} {
    %c0 = arith.constant 0 : index
    %c0_0 = arith.constant 0 : index
    %c0_1 = arith.constant 0 : index
    %0 = vector.load %arg1[%c0, %c0_0, %c0_1] : memref<8x8x32xbf16, #tpu.memory_space<vmem>>, vector<8x8x32xbf16>
    %1 = arith.extf %0 : vector<8x8x32xbf16> to vector<8x8x32xf32>
    %c0_2 = arith.constant 0 : index
    %c0_3 = arith.constant 0 : index
    %2 = vector.load %arg2[%c0_2, %c0_3] : memref<1x32xf32, #tpu.memory_space<vmem>>, vector<1x32xf32>
    %c0_4 = arith.constant 0 : index
    %c0_5 = arith.constant 0 : index
    %3 = memref.load %arg3[%c0_4, %c0_5] : memref<1x1xf32, #tpu.memory_space<smem>>
    %4 = vector.shape_cast %2 : vector<1x32xf32> to vector<1x1x32xf32>
    %5 = vector.broadcast %4 : vector<1x1x32xf32> to vector<8x8x32xf32>
    %6 = arith.mulf %1, %5 : vector<8x8x32xf32>
    %cst = arith.constant dense<0.000000e+00> : vector<8x8xf32>
    %7 = vector.multi_reduction <add>, %6, %cst [2] : vector<8x8x32xf32> to vector<8x8xf32>
    %8 = vector.broadcast %3 : f32 to vector<8x8xf32>
    %9 = arith.addf %7, %8 : vector<8x8xf32>
    %cst_6 = arith.constant dense<0xFF800000> : vector<8xf32>
    %10 = vector.multi_reduction <maximumf>, %9, %cst_6 [1] : vector<8x8xf32> to vector<8xf32>
    %11 = vector.shape_cast %10 : vector<8xf32> to vector<8x1xf32>
    %12 = vector.broadcast %11 : vector<8x1xf32> to vector<8x8xf32>
    %13 = arith.subf %9, %12 : vector<8x8xf32>
    %14 = math.exp %13 : vector<8x8xf32>
    %cst_7 = arith.constant dense<0.000000e+00> : vector<8xf32>
    %15 = vector.multi_reduction <add>, %14, %cst_7 [1] : vector<8x8xf32> to vector<8xf32>
    %16 = vector.shape_cast %15 : vector<8xf32> to vector<8x1xf32>
    %17 = tpu.reciprocal %16 : vector<8x1xf32> -> vector<8x1xf32>
    %18 = vector.broadcast %17 : vector<8x1xf32> to vector<8x8xf32>
    %19 = arith.mulf %14, %18 : vector<8x8xf32>
    %20 = vector.shape_cast %19 : vector<8x8xf32> to vector<8x8x1xf32>
    %21 = vector.broadcast %20 : vector<8x8x1xf32> to vector<8x8x32xf32>
    %22 = arith.mulf %21, %1 : vector<8x8x32xf32>
    %cst_8 = arith.constant dense<0.000000e+00> : vector<8x32xf32>
    %23 = vector.multi_reduction <add>, %22, %cst_8 [1] : vector<8x8x32xf32> to vector<8x32xf32>
    %c0_9 = arith.constant 0 : index
    %c0_10 = arith.constant 0 : index
    %24 = vector.load %arg4[%c0_9, %c0_10] : memref<32x128xf32, #tpu.memory_space<vmem>>, vector<32x128xf32>
    %cst_11 = arith.constant dense<0.000000e+00> : vector<8x128xf32>
    %25 = tpu.matmul %23, %24, %cst_11 {dimension_numbers = #tpu.dot_dimension_numbers<[1], [0], [0], [1], [0, 0, 1, 1], [], []>} : vector<8x32xf32>, vector<32x128xf32>, vector<8x128xf32> -> vector<8x128xf32>
    %c0_12 = arith.constant 0 : index
    %c0_13 = arith.constant 0 : index
    %26 = vector.load %arg5[%c0_12, %c0_13] : memref<1x128xf32, #tpu.memory_space<vmem>>, vector<1x128xf32>
    %27 = vector.broadcast %26 : vector<1x128xf32> to vector<8x128xf32>
    %28 = arith.addf %25, %27 : vector<8x128xf32>
    %c0_14 = arith.constant 0 : index
    %c0_15 = arith.constant 0 : index
    %29 = vector.load %arg6[%c0_14, %c0_15] : memref<8x128xf32, #tpu.memory_space<vmem>>, vector<8x128xf32>
    tpu.vector_store %arg6[%c0_14, %c0_15], %28 {strides = array<i32>} : memref<8x128xf32, #tpu.memory_space<vmem>>, vector<8x128xf32>,
    return
  }
  func.func @transform_0(%arg0: i32) -> (i32, i32, i32) {
    %c0_i32 = arith.constant 0 : i32
    %c0_i32_0 = arith.constant 0 : i32
    %c0_i32_1 = arith.constant 0 : i32
    return %arg0, %c0_i32, %c0_i32_0 : i32, i32, i32
  }
  func.func @transform_1(%arg0: i32) -> (i32, i32) {
    %c0_i32 = arith.constant 0 : i32
    %c0_i32_0 = arith.constant 0 : i32
    %c0_i32_1 = arith.constant 0 : i32
    return %c0_i32, %c0_i32_0 : i32, i32
  }
  func.func @transform_2(%arg0: i32) -> (i32, i32) {
    %c0_i32 = arith.constant 0 : i32
    %c0_i32_0 = arith.constant 0 : i32
    %c0_i32_1 = arith.constant 0 : i32
    return %c0_i32, %c0_i32_0 : i32, i32
  }
  func.func @transform_3(%arg0: i32) -> (i32, i32) {
    %c0_i32 = arith.constant 0 : i32
    %c0_i32_0 = arith.constant 0 : i32
    %c0_i32_1 = arith.constant 0 : i32
    return %c0_i32, %c0_i32_0 : i32, i32
  }
  func.func @transform_4(%arg0: i32) -> (i32, i32) {
    %c0_i32 = arith.constant 0 : i32
    %c0_i32_0 = arith.constant 0 : i32
    %c0_i32_1 = arith.constant 0 : i32
    return %c0_i32, %c0_i32_0 : i32, i32
  }
  func.func @transform_5(%arg0: i32) -> (i32, i32) {
    %c0_i32 = arith.constant 0 : i32
    %c0_i32_0 = arith.constant 0 : i32
    return %arg0, %c0_i32 : i32, i32
  }
}

</mosaic_0001>

<bundles_post_ra>
// kernel: custom-call.2
= control target key start
LH: loop header
LB: loop body
LE: loop exit
PB: predicated region body
PF: predicated region fallthrough
CT: control target
= control target key end

     0   :  { %s6_s0 = inlined_call_operand.vmem [shape: f32[2,16], index: 0, kind: output, shape index: {}]  }

// kernel: model_forward.1
= control target key start
LH: loop header
LB: loop body
LE: loop exit
PB: predicated region body
PF: predicated region fallthrough
CT: control target
= control target key end

     0   :  { %vm53_vm0 = vcmask 261120   ;;  %v95_v29 = vlaneseq  ;;  %vm129_vm1 = vcmask 1041409   ;;  %vm131_vm2 = vcmask 1042434   ;;  %s832_s0 = inlined_call_operand.vmem [shape: bf16[8,8,32], index: 0, kind: input, shape index: {}]   ;;  %s833_s1 = inlined_call_operand.vmem [shape: f32[1,32], index: 1, kind: input, shape index: {}]   ;;  %s834_s2 = inlined_call_operand.<no memory space> [shape: f32[1,1], index: 2, kind: input, shape index: {}]   ;;  %s835_s3 = inlined_call_operand.vmem [shape: f32[32,128], index: 3, kind: input, shape index: {}]   ;;  %s836_s4 = inlined_call_operand.vmem [shape: f32[1,128], index: 4, kind: input, shape index: {}]   ;;  %s837_s5 = inlined_call_operand.vmem [shape: f32[8,128], index: 5, kind: output, shape index: {}]  }
   0x1   :  { %v650_v0 = vld [vmem:[%s832_s0] sm:$0xff]   ;;  %v658_v2 = vld [vmem:[%s832_s0 + $0x8] sm:$0xff]   ;;  %v667_v7 = vld [vmem:[%s832_s0 + $0x10] sm:$0xff]   ;;  %v78_v32 = vstv %s834_s2  ;;  %vm133_vm3 = vcmask 1043459   ;;  %vm135_vm4 = vcmask 1044484   ;;  %vm137_vm5 = vcmask 1045509  }
   0x2   :  { %v545_v1 = vld [vmem:[%s833_s1] ss:$0 sm:$0xff]  ;;  %v550_v3 = vunpack.c.l.bf16 %v650_v0  ;;  %v554_v4 = vunpack.c.l.bf16 %v658_v2  ;;  %v551_v5 = vunpack.c.h.bf16 %v650_v0  ;;  %v555_v6 = vunpack.c.h.bf16 %v658_v2  ;;  %v682_v14 = vld [vmem:[%s832_s0 + $0x18] sm:$0xff]  }
   0x3   :  { %v558_v8 = vunpack.c.l.bf16 %v667_v7  ;;  %v559_v9 = vunpack.c.h.bf16 %v667_v7  ;;  %v562_v17 = vunpack.c.l.bf16 %v682_v14  ;;  %v563_v18 = vunpack.c.h.bf16 %v682_v14 }
   0x4   :  { %v45_v10 = vmul.f32 %v550_v3, %v545_v1  ;;  %v47_v11 = vmul.f32 %v554_v4, %v545_v1  ;;  %v46_v12 = vmul.f32 %v551_v5, %v545_v1  ;;  %v48_v13 = vmul.f32 %v555_v6, %v545_v1 }
   0x5   :  { %v49_v21 = vmul.f32 %v558_v8, %v545_v1  ;;  %v50_v22 = vmul.f32 %v559_v9, %v545_v1  ;;  %v51_v25 = vmul.f32 %v562_v17, %v545_v1  ;;  %v52_v26 = vmul.f32 %v563_v18, %v545_v1 }
   0x6   :  { %v54_v15 = vsel %vm53_vm0, %v45_v10, 0.0  ;;  %v60_v16 = vsel %vm53_vm0, %v47_v11, 0.0  ;;  %v57_v19 = vsel %vm53_vm0, %v46_v12, 0.0  ;;  %v63_v20 = vsel %vm53_vm0, %v48_v13, 0.0 }
   0x7   :  { %55 = vadd.xlane.f32.xlu0 %v54_v15  ;;  %61 = vadd.xlane.f32.xlu1 %v60_v16  ;;  %v66_v23 = vsel %vm53_vm0, %v49_v21, 0.0  ;;  %v69_v24 = vsel %vm53_vm0, %v50_v22, 0.0  ;;  %v72_v27 = vsel %vm53_vm0, %v51_v25, 0.0  ;;  %v75_v28 = vsel %vm53_vm0, %v52_v26, 0.0 }
   0x8   :  { %v96_v30 = vand.u32 127, %v95_v29  ;;  %v702_v31 = vshrl.u32 %v95_v29, 7  ;;  %vm139_vm6 = vcmask 1046534   ;;  %vm141_vm7 = vcmask 1047559  }
   0x9   :  { %vm144_vm8 = vcmask 64512   ;;  %v613_v11 = vmov 0   ;;  %vm615_vm9 = vmmov 0  }
   0xa   :  { %v708_v35 = vsub.s32 %v96_v30, %v702_v31  ;;  %594 = vset.pattern.permute.xlu0 %v613_v11  ;;  %593 = vset.pattern.permute.xlu1 %v613_v11  ;;  %v151_v12 = vsub.s32 0, %v702_v31  ;;  %v155_v13 = vsub.s32 1, %v702_v31  ;;  %v159_v15 = vsub.s32 2, %v702_v31 }
   0xb   :  { %58 = vadd.xlane.f32.xlu0 %v57_v19  ;;  %64 = vadd.xlane.f32.xlu1 %v63_v20  ;;  %v163_v16 = vsub.s32 3, %v702_v31  ;;  %v171_v30 = vsub.s32 5, %v702_v31 }
   0xf   :  { %67 = vadd.xlane.f32.xlu0 %v66_v23  ;;  %70 = vadd.xlane.f32.xlu1 %v69_v24  ;;  %v167_v23 = vsub.s32 4, %v702_v31 }
  0x13   :  { %73 = vadd.xlane.f32.xlu0 %v72_v27  ;;  %76 = vadd.xlane.f32.xlu1 %v75_v28 }
  0x94   :  { %v56_v33 = vpop.xlane.xlu0 %55  ;;  %v62_v34 = vpop.xlane.xlu1 %61 }
  0x95   :  { %v79_v36 = vadd.f32 %v78_v32, %v56_v33  ;;  %v81_v37 = vadd.f32 %v78_v32, %v62_v34 }
  0x97   :  { %v100_v42 = vrot.slane %v79_v36, %v708_v35  ;;  %v108_v45 = vrot.slane %v81_v37, %v708_v35 }
  0x98   :  { %v59_v38 = vpop.xlane.xlu0 %58  ;;  %v65_v39 = vpop.xlane.xlu1 %64 }
  0x99   :  { %v80_v40 = vadd.f32 %v78_v32, %v59_v38  ;;  %v82_v41 = vadd.f32 %v78_v32, %v65_v39  ;;  %v175_v38 = vsub.s32 6, %v702_v31 }
  0x9b   :  { %v104_v43 = vrot.slane %v80_v40, %v708_v35  ;;  %v112_v44 = vrot.slane %v82_v41, %v708_v35 }
  0x9c   :  { %v68_v46 = vpop.xlane.xlu0 %67  ;;  %v71_v47 = vpop.xlane.xlu1 %70 }
  0x9d   :  { %v130_v48 = vsel %vm129_vm1, %v104_v43, %v100_v42  ;;  %v83_v49 = vadd.f32 %v78_v32, %v68_v46  ;;  %v84_v50 = vadd.f32 %v78_v32, %v71_v47 }
  0x9e   :  { %v132_v51 = vsel %vm131_vm2, %v108_v45, %v130_v48 }
  0x9f   :  { %v134_v52 = vsel %vm133_vm3, %v112_v44, %v132_v51  ;;  %v116_v53 = vrot.slane %v83_v49, %v708_v35  ;;  %v120_v54 = vrot.slane %v84_v50, %v708_v35 }
  0xa0   :  { %v74_v55 = vpop.xlane.xlu0 %73  ;;  %v77_v56 = vpop.xlane.xlu1 %76 }
  0xa1   :  { %v136_v57 = vsel %vm135_vm4, %v116_v53, %v134_v52  ;;  %v85_v58 = vadd.f32 %v78_v32, %v74_v55  ;;  %v86_v59 = vadd.f32 %v78_v32, %v77_v56 }
  0xa2   :  { %v138_v62 = vsel %vm137_vm5, %v120_v54, %v136_v57 }
  0xa3   :  { %v124_v60 = vrot.slane %v85_v58, %v708_v35  ;;  %v128_v61 = vrot.slane %v86_v59, %v708_v35 }
  0xa5   :  { %v140_v63 = vsel %vm139_vm6, %v124_v60, %v138_v62 }
  0xa6   :  { %v142_v1 = vsel %vm141_vm7, %v128_v61, %v140_v63 }
  0xa7   :  { %v145_v10 = vsel %vm144_vm8, %v142_v1, -inf }
  0xa8   :  { %146 = vmax.xlane.f32.xlu0 %v145_v10 }
 0x135   :  { %v147_v19 = vpop.xlane.xlu0 %146 }
 0x136   :  { %v152_v20 = vrot.slane %v147_v19, %v151_v12  ;;  %v156_v21 = vrot.slane %v147_v19, %v155_v13  ;;  %v160_v22 = vrot.slane %v147_v19, %v159_v15  ;;  %v164_v24 = vrot.slane %v147_v19, %v163_v16 }
 0x137   :  { %v168_v32 = vrot.slane %v147_v19, %v167_v23  ;;  %v172_v39 = vrot.slane %v147_v19, %v171_v30 }
 0x138   :  { %v189_v25 = vsub.f32 %v79_v36, %v152_v20  ;;  %v190_v26 = vsub.f32 %v80_v40, %v156_v21  ;;  %v191_v27 = vsub.f32 %v81_v37, %v160_v22  ;;  %v192_v33 = vsub.f32 %v82_v41, %v164_v24 }
 0x139   :  { %v193_v42 = vsub.f32 %v83_v49, %v168_v32  ;;  %v179_v37 = vsub.s32 7, %v702_v31  ;;  %v176_v40 = vrot.slane %v147_v19, %v175_v38  ;;  %v194_v43 = vsub.f32 %v84_v50, %v172_v39  ;;  %v445_v31 = vld [vmem:[%s835_s3 + $0x18] sm:$0xff] }
 0x13a   :  { %v197_v28 = vmul.f32 1.442695, %v189_v25  ;;  %v199_v29 = vmul.f32 1.442695, %v190_v26  ;;  %v201_v34 = vmul.f32 1.442695, %v191_v27 }
 0x13b   :  { %v203_v36 = vmul.f32 1.442695, %v192_v33  ;;  %v205_v44 = vmul.f32 1.442695, %v193_v42  ;;  %v180_v46 = vrot.slane %v147_v19, %v179_v37  ;;  %v195_v47 = vsub.f32 %v85_v58, %v176_v40 }
 0x13c   :  { %595 = vpow2.f32 %v197_v28  ;;  %v207_v48 = vmul.f32 1.442695, %v194_v43 }
 0x13d   :  { %597 = vpow2.f32 %v199_v29  ;;  %v196_v51 = vsub.f32 %v86_v59, %v180_v46  ;;  %v209_v52 = vmul.f32 1.442695, %v195_v47 }
 0x13e   :  { %599 = vpow2.f32 %v201_v34 }
 0x13f   :  { %601 = vpow2.f32 %v203_v36  ;;  %v211_v50 = vmul.f32 1.442695, %v196_v51 }
 0x140   :  { %603 = vpow2.f32 %v205_v44 }
 0x141   :  { %605 = vpow2.f32 %v207_v48 }
 0x142   :  { %607 = vpow2.f32 %v209_v52 }
 0x143   :  { %609 = vpow2.f32 %v211_v50 }
 0x146   :  { %v596_v41 = vpop.eup %595 }
 0x147   :  { %v598_v45 = vpop.eup %597  ;;  %222 = vperm.xlu1 %593, %v596_v41  }
 0x148   :  { %225 = vperm.xlu0 %594, %v598_v45   ;;  %v600_v49 = vpop.eup %599 }
 0x149   :  { %v602_v53 = vpop.eup %601 }
 0x14a   :  { %v604_v54 = vpop.eup %603 }
 0x14b   :  { %228 = vperm.xlu1 %593, %v600_v49   ;;  %v606_v55 = vpop.eup %605 }
 0x14c   :  { %v608_v56 = vpop.eup %607 }
 0x14d   :  { %v610_v57 = vpop.eup %609 }
 0x14f   :  { %231 = vperm.xlu1 %593, %v602_v53  }
 0x153   :  { %234 = vperm.xlu1 %593, %v604_v54  }
 0x157   :  { %237 = vperm.xlu1 %593, %v606_v55  }
 0x15b   :  { %240 = vperm.xlu1 %593, %v608_v56  }
 0x15f   :  { %243 = vperm.xlu1 %593, %v610_v57  }
 0x1c6   :  { %v223_v58 = vpop.permute.xlu1 %222 }
 0x1c7   :  { %v226_v59 = vpop.permute.xlu0 %225  ;;  %v248_v10 = vrot.slane %v223_v58, %v708_v35 }
 0x1c8   :  { %v252_v1 = vrot.slane %v226_v59, %v708_v35 }
 0x1ca   :  { %v229_v60 = vpop.permute.xlu1 %228  ;;  %v277_v22 = vsel %vm129_vm1, %v252_v1, %v248_v10 }
 0x1cb   :  { %v256_v11 = vrot.slane %v229_v60, %v708_v35 }
 0x1cd   :  { %v278_v25 = vsel %vm131_vm2, %v256_v11, %v277_v22 }
 0x1ce   :  { %v232_v61 = vpop.permute.xlu1 %231 }
 0x1cf   :  { %v260_v19 = vrot.slane %v232_v61, %v708_v35 }
 0x1d1   :  { %v279_v27 = vsel %vm133_vm3, %v260_v19, %v278_v25 }
 0x1d2   :  { %v235_v62 = vpop.permute.xlu1 %234 }
 0x1d3   :  { %v264_v20 = vrot.slane %v235_v62, %v708_v35 }
 0x1d5   :  { %v280_v28 = vsel %vm135_vm4, %v264_v20, %v279_v27 }
 0x1d6   :  { %v238_v63 = vpop.permute.xlu1 %237 }
 0x1d7   :  { %v268_v24 = vrot.slane %v238_v63, %v708_v35 }
 0x1d9   :  { %v281_v32 = vsel %vm137_vm5, %v268_v24, %v280_v28 }
 0x1da   :  { %v241_v21 = vpop.permute.xlu1 %240 }
 0x1db   :  { %v272_v26 = vrot.slane %v241_v21, %v708_v35 }
 0x1dd   :  { %v282_v34 = vsel %vm139_vm6, %v272_v26, %v281_v32 }
 0x1de   :  { %v244_v29 = vpop.permute.xlu1 %243 }
 0x1df   :  { %v276_v33 = vrot.slane %v244_v29, %v708_v35 }
 0x1e1   :  { %v283_v39 = vsel %vm141_vm7, %v276_v33, %v282_v34 }
 0x1e2   :  { %v285_v42 = vsel %vm144_vm8, %v283_v39, 0.0 }
 0x1e3   :  { %286 = vadd.xlane.f32.xlu1 %v285_v42 }
 0x270   :  { %v287_v36 = vpop.xlane.xlu1 %286 }
 0x271   :  { %611 = vrcp.f32 %v287_v36 }
 0x27b   :  { %v612_v40 = vpop.eup %611 }
 0x27c   :  { %v293_v43 = vrot.slane %v612_v40, %v151_v12  ;;  %v297_v46 = vrot.slane %v612_v40, %v155_v13  ;;  %v301_v35 = vrot.slane %v612_v40, %v159_v15  ;;  %v305_v51 = vrot.slane %v612_v40, %v163_v16 }
 0x27d   :  { %v309_v50 = vrot.slane %v612_v40, %v167_v23  ;;  %v313_v13 = vrot.slane %v612_v40, %v171_v30  ;;  %v317_v15 = vrot.slane %v612_v40, %v175_v38  ;;  %v321_v16 = vrot.slane %v612_v40, %v179_v37  ;;  %v442_v23 = vld [vmem:[%s835_s3] sm:$0xff]  ;;  %v443_v30 = vld [vmem:[%s835_s3 + $0x8] sm:$0xff]  ;;  %v444_v38 = vld [vmem:[%s835_s3 + $0x10] sm:$0xff] }
 0x27e   :  { %v330_v44 = vmul.f32 %v596_v41, %v293_v43  ;;  %v331_v47 = vmul.f32 %v598_v45, %v297_v46  ;;  %v332_v48 = vmul.f32 %v600_v49, %v301_v35  ;;  %v333_v52 = vmul.f32 %v602_v53, %v305_v51 }
 0x27f   :  { %v334_v12 = vmul.f32 %v604_v54, %v309_v50  ;;  %v335_v41 = vmul.f32 %v606_v55, %v313_v13  ;;  %v336_v45 = vmul.f32 %v608_v56, %v317_v15  ;;  %v337_v49 = vmul.f32 %v610_v57, %v321_v16 }
 0x280   :  { %340 = vperm.xlu0 %594, %v330_v44   ;;  %v614_v53 = vmov 0.0|0.0   ;;  %v584_v54 = vpack.c.bf16 %v443_v30, %v442_v23  ;;  %v616_v37 = vmov 0.0   ;;  %v587_v55 = vpack.c.bf16 %v445_v31, %v444_v38 }
 0x281   :  { %583 = vmatprep.subr.bf16.mxu0 %v614_v53  ;;  %580 = vmatprep.mubr.msk.f32.mxu0 %vm615_vm9, %v616_v37 }
 0x282   :  { %585 = vmatpush3.bf16.msra.mxu0 %v584_v54 }
 0x283   :  { %586 = vmatprep.subr.bf16.mxu0 %v614_v53 }
 0x284   :  { %345 = vperm.xlu0 %594, %v331_v47  }
 0x286   :  { %588 = vmatpush3.bf16.msra.mxu0 %v587_v55 }
 0x288   :  { %350 = vperm.xlu0 %594, %v332_v48  }
 0x28c   :  { %355 = vperm.xlu0 %594, %v333_v52  }
 0x290   :  { %360 = vperm.xlu0 %594, %v334_v12  }
 0x294   :  { %365 = vperm.xlu0 %594, %v335_v41  }
 0x298   :  { %370 = vperm.xlu0 %594, %v336_v45  }
 0x29c   :  { %375 = vperm.xlu0 %594, %v337_v49  }
 0x2ff   :  { %v341_v56 = vpop.permute.xlu0 %340 }
 0x300   :  { %v378_v61 = vmul.f32 %v550_v3, %v341_v56 }
 0x302   :  { %v386_v10 = vsel %vm53_vm0, %v378_v61, 0.0 }
 0x303   :  { %v346_v57 = vpop.permute.xlu0 %345  ;;  %v387_v21 = vrot.slane %v386_v10, 4 }
 0x304   :  { %v379_v58 = vmul.f32 %v551_v5, %v346_v57 }
 0x305   :  { %v388_v26 = vadd.f32 %v387_v21, %v386_v10 }
 0x306   :  { %v393_v59 = vsel %vm53_vm0, %v379_v58, 0.0 }
 0x307   :  { %v351_v60 = vpop.permute.xlu0 %350  ;;  %v394_v19 = vrot.slane %v393_v59, 4  ;;  %v389_v39 = vrot.slane %v388_v26, 2 }
 0x308   :  { %v380_v62 = vmul.f32 %v554_v4, %v351_v60 }
 0x309   :  { %v395_v22 = vadd.f32 %v394_v19, %v393_v59  ;;  %v390_v7 = vadd.f32 %v389_v39, %v388_v26 }
 0x30a   :  { %v400_v63 = vsel %vm53_vm0, %v380_v62, 0.0 }
 0x30b   :  { %v356_v1 = vpop.permute.xlu0 %355  ;;  %v401_v20 = vrot.slane %v400_v63, 4  ;;  %v391_v16 = vrot.slane %v390_v7, 1 }
 0x30c   :  { %v381_v11 = vmul.f32 %v555_v6, %v356_v1  ;;  %v396_v6 = vrot.slane %v395_v22, 2 }
 0x30d   :  { %v402_v24 = vadd.f32 %v401_v20, %v400_v63  ;;  %v392_v56 = vadd.f32 %v391_v16, %v390_v7 }
 0x30e   :  { %v407_v5 = vsel %vm53_vm0, %v381_v11, 0.0  ;;  %v397_v44 = vadd.f32 %v396_v6, %v395_v22 }
 0x30f   :  { %v408_v0 = vrot.slane %v407_v5, 4  ;;  %v361_v3 = vpop.permute.xlu0 %360  ;;  %v403_v33 = vrot.slane %v402_v24, 2 }
 0x310   :  { %v382_v4 = vmul.f32 %v558_v8, %v361_v3  ;;  %v398_v13 = vrot.slane %v397_v44, 1 }
 0x311   :  { %v409_v27 = vadd.f32 %v408_v0, %v407_v5  ;;  %v404_v47 = vadd.f32 %v403_v33, %v402_v24  ;;  %v546_v0 = vld [vmem:[%s836_s4] ss:$0 sm:$0xff] }
 0x312   :  { %v414_v25 = vsel %vm53_vm0, %v382_v4, 0.0  ;;  %v399_v53 = vadd.f32 %v398_v13, %v397_v44 }
 0x313   :  { %v415_v28 = vrot.slane %v414_v25, 4  ;;  %v366_v29 = vpop.permute.xlu0 %365  ;;  %v410_v42 = vrot.slane %v409_v27, 2  ;;  %v405_v45 = vrot.slane %v404_v47, 1 }
 0x314   :  { %v383_v2 = vmul.f32 %v559_v9, %v366_v29  ;;  %v461_v60 = vsel %vm129_vm1, %v399_v53, %v392_v56 }
 0x315   :  { %v416_v32 = vadd.f32 %v415_v28, %v414_v25  ;;  %v411_v9 = vadd.f32 %v410_v42, %v409_v27  ;;  %v406_v55 = vadd.f32 %v405_v45, %v404_v47 }
 0x316   :  { %v421_v34 = vsel %vm53_vm0, %v383_v2, 0.0 }
 0x317   :  { %v422_v36 = vrot.slane %v421_v34, 4  ;;  %v371_v8 = vpop.permute.xlu0 %370  ;;  %v417_v40 = vrot.slane %v416_v32, 2  ;;  %v412_v49 = vrot.slane %v411_v9, 1  ;;  %v462_v59 = vsel %vm131_vm2, %v406_v55, %v461_v60 }
 0x318   :  { %v384_v43 = vmul.f32 %v562_v17, %v371_v8 }
 0x319   :  { %v423_v46 = vadd.f32 %v422_v36, %v421_v34  ;;  %v418_v50 = vadd.f32 %v417_v40, %v416_v32  ;;  %v413_v57 = vadd.f32 %v412_v49, %v411_v9 }
 0x31a   :  { %v428_v35 = vsel %vm53_vm0, %v384_v43, 0.0 }
 0x31b   :  { %v424_v48 = vrot.slane %v423_v46, 2  ;;  %v429_v51 = vrot.slane %v428_v35, 4  ;;  %v376_v52 = vpop.permute.xlu0 %375  ;;  %v419_v38 = vrot.slane %v418_v50, 1  ;;  %v463_v1 = vsel %vm133_vm3, %v413_v57, %v462_v59 }
 0x31c   :  { %v385_v12 = vmul.f32 %v563_v18, %v376_v52 }
 0x31d   :  { %v425_v41 = vadd.f32 %v424_v48, %v423_v46  ;;  %v430_v15 = vadd.f32 %v429_v51, %v428_v35  ;;  %v420_v58 = vadd.f32 %v419_v38, %v418_v50 }
 0x31e   :  { %v435_v17 = vsel %vm53_vm0, %v385_v12, 0.0 }
 0x31f   :  { %v431_v23 = vrot.slane %v430_v15, 2  ;;  %v436_v30 = vrot.slane %v435_v17, 4  ;;  %v426_v54 = vrot.slane %v425_v41, 1  ;;  %v464_v11 = vsel %vm135_vm4, %v420_v58, %v463_v1 }
 0x321   :  { %v432_v31 = vadd.f32 %v431_v23, %v430_v15  ;;  %v437_v37 = vadd.f32 %v436_v30, %v435_v17  ;;  %v427_v61 = vadd.f32 %v426_v54, %v425_v41 }
 0x323   :  { %v433_v14 = vrot.slane %v432_v31, 1  ;;  %v438_v18 = vrot.slane %v437_v37, 2  ;;  %v465_v20 = vsel %vm137_vm5, %v427_v61, %v464_v11 }
 0x325   :  { %v439_v62 = vadd.f32 %v438_v18, %v437_v37  ;;  %v434_v63 = vadd.f32 %v433_v14, %v432_v31 }
 0x327   :  { %v440_v10 = vrot.slane %v439_v62, 1  ;;  %v466_v5 = vsel %vm139_vm6, %v434_v63, %v465_v20 }
 0x329   :  { %v441_v19 = vadd.f32 %v440_v10, %v439_v62 }
 0x32b   :  { %v467_v21 = vsel %vm141_vm7, %v441_v19, %v466_v5 }
 0x32c   :  { %581 = vmatmul.mubr.msk.f32.vlgmr.msra.gmra.mrb[0].mxu0 %vm53_vm0, %v467_v21 }
 0x3ff   :  { %v536_v3 = vpop.f32.mrb[0].mxu0 }
 0x400   :  { %v537_v4 = vadd.f32 %v546_v0, %v536_v3  ;;  %v582_v22 = vpop.f32.mrb[1].mxu0 }
 0x402   :  { %540 = vst [vmem:[%s837_s5] sm:$0xff] %v537_v4 }

</bundles_post_ra>
